<compile_context>
chip_gen: v7x
topology: tpu7x:2x2x1
jax: 0.10.0
libtpu: 0.0.40
codegen_flags: <defaults>
</compile_context>

<pallas_src>
import functools

import jax
import jax.numpy as jnp
from jax.experimental import pallas as pl
from jax.experimental.pallas import tpu as pltpu


def _lstm_regression_kernel(x_ref, wih_ref, whh_ref, b_ref, wout_ref, bout_ref,
                            y_ref, *, seq_len, batch, hidden):
    H = hidden
    B = batch

    # ---- Phase 1 (parallel): hoisted input projection, one big MXU matmul ----
    # bf16 operands, f32 accumulation; bias added once.  Result stays in vregs
    # (no VMEM scratch, no per-step re-load inside the serial loop).
    xp = jnp.dot(x_ref[...], wih_ref[...],
                 preferred_element_type=jnp.float32) + b_ref[...]      # (S*B, 4H) f32

    # Recurrent weight loaded once (2 vregs in bf16 at H=32); stays resident.
    whh = whh_ref[...]                                                  # (H, 4H) bf16

    # ---- Phase 2 (sequential): recurrence; only h @ W_hh on critical path ----
    h = jnp.zeros((B, H), jnp.float32)      # PyTorch default h0 = c0 = 0
    c = jnp.zeros((B, H), jnp.float32)
    hs = []                                 # h_t collected as values (no scratch)

    for t in range(seq_len):                # static, fully unrolled (S known)
        # Static slice of the in-vreg projection: not a VMEM load.
        gates = xp[t * B:(t + 1) * B, :] + jnp.dot(
            h.astype(whh.dtype), whh, preferred_element_type=jnp.float32)  # (B,4H) f32

        # Gate order was permuted in the wrapper to [i, f, o, g]:
        # one contiguous sigmoid over (B, 3H), one tanh over (B, H).
        # sigmoid(x) = 0.5 * tanh(0.5 * x) + 0.5  -> single EUP op, no divide.
        sig = 0.5 * jnp.tanh(0.5 * gates[:, :3 * H]) + 0.5
        g = jnp.tanh(gates[:, 3 * H:])
        i = sig[:, :H]
        f = sig[:, H:2 * H]
        o = sig[:, 2 * H:]

        c = f * c + i * g
        h = o * jnp.tanh(c)
        hs.append(h)

    hs_all = jnp.concatenate(hs, axis=0)                                # (S*B, H) f32

    # ---- Phase 3 (parallel): batched Linear head, single lane-dense store ----
    # W_out / b_out are zero-padded to 128 lanes in the wrapper so this store
    # is a full-lane (unmasked) vst; wrapper slices back to O outside.
    y_ref[...] = (jnp.dot(hs_all.astype(wout_ref.dtype), wout_ref[...],
                          preferred_element_type=jnp.float32)
                  + bout_ref[...]).astype(y_ref.dtype)


def lstm_regression_forward(x, w_ih, w_hh, b_ih, b_hh, w_out, b_out):
    """x: (S, B, D) float32 (time-major, like nn.LSTM batch_first=False).
    Returns (S, B, output_dim)."""
    S, B, D = x.shape
    H = w_hh.shape[1]
    O = w_out.shape[0]
    O_pad = max(128, ((O + 127) // 128) * 128)   # lane-dense output width

    def reorder(w):
        # PyTorch gate order along 4H is [i, f, g, o]; permute to [i, f, o, g]
        # so the kernel applies sigmoid/tanh to contiguous slices.
        Hh = w.shape[0] // 4
        return jnp.concatenate([w[:2 * Hh], w[3 * Hh:], w[2 * Hh:3 * Hh]],
                               axis=0)

    mxu_dtype = jnp.bfloat16   # MXU operands in bf16; all accumulation in f32

    # Pre-transpose weights so the kernel does (M, K) @ (K, N) matmuls.
    wih_t = reorder(jnp.asarray(w_ih, jnp.float32)).T.astype(mxu_dtype)   # (D, 4H)
    whh_t = reorder(jnp.asarray(w_hh, jnp.float32)).T.astype(mxu_dtype)   # (H, 4H)
    b = reorder(jnp.asarray(b_ih, jnp.float32)
                + jnp.asarray(b_hh, jnp.float32)).reshape(1, 4 * H)       # f32

    # Zero-pad the head to 128 lanes so the kernel's final store is unmasked.
    wout_t = jnp.asarray(w_out, jnp.float32).T                            # (H, O)
    wout_pad = jnp.zeros((H, O_pad), jnp.float32).at[:, :O].set(wout_t)
    wout_pad = wout_pad.astype(mxu_dtype)                                 # (H, 128)
    bout_pad = jnp.zeros((1, O_pad), jnp.float32).at[:, :O].set(
        jnp.asarray(b_out, jnp.float32).reshape(1, O))                    # (1, 128)

    x2d = jnp.asarray(x, jnp.float32).reshape(S * B, D).astype(mxu_dtype)

    kernel = functools.partial(_lstm_regression_kernel,
                               seq_len=S, batch=B, hidden=H)

    y_pad = pl.pallas_call(
        kernel,
        out_shape=jax.ShapeDtypeStruct((S * B, O_pad), jnp.float32),
        in_specs=[pl.BlockSpec(memory_space=pltpu.MemorySpace.VMEM)] * 6,
        out_specs=pl.BlockSpec(memory_space=pltpu.MemorySpace.VMEM),
    )(x2d, wih_t, whh_t, b, wout_pad, bout_pad)

    return y_pad[:, :O].reshape(S, B, O)


def lstm_regression_reference(x, w_ih, w_hh, b_ih, b_hh, w_out, b_out):
    """Pure-JAX f32 reference matching PyTorch nn.LSTM + nn.Linear semantics."""
    S, B, D = x.shape
    H = w_hh.shape[1]

    def step(carry, x_t):
        h, c = carry
        gates = x_t @ w_ih.T + h @ w_hh.T + b_ih + b_hh
        i = jax.nn.sigmoid(gates[:, 0 * H:1 * H])
        f = jax.nn.sigmoid(gates[:, 1 * H:2 * H])
        g = jnp.tanh(gates[:, 2 * H:3 * H])
        o = jax.nn.sigmoid(gates[:, 3 * H:4 * H])
        c_new = f * c + i * g
        h_new = o * jnp.tanh(c_new)
        return (h_new, c_new), h_new

    h0 = jnp.zeros((B, H), jnp.float32)
    c0 = jnp.zeros((B, H), jnp.float32)
    _, hs = jax.lax.scan(step, (h0, c0), x)          # (S, B, H)
    y = hs.reshape(S * B, H) @ w_out.T + b_out
    return y.reshape(S, B, -1)


if __name__ == "__main__":
    # Small shapes implied by the forward: data is (seq, batch, input_dim).
    S, B = 8, 4
    input_dim, hidden, output_dim = 16, 32, 8

    key = jax.random.PRNGKey(0)
    ks = jax.random.split(key, 8)
    bound = 1.0 / jnp.sqrt(hidden)   # PyTorch default uniform init range

    x = jax.random.normal(ks[0], (S, B, input_dim), jnp.float32)
    w_ih = jax.random.uniform(ks[1], (4 * hidden, input_dim), jnp.float32, -bound, bound)
    w_hh = jax.random.uniform(ks[2], (4 * hidden, hidden), jnp.float32, -bound, bound)
    b_ih = jax.random.uniform(ks[3], (4 * hidden,), jnp.float32, -bound, bound)
    b_hh = jax.random.uniform(ks[4], (4 * hidden,), jnp.float32, -bound, bound)
    w_out = jax.random.uniform(ks[5], (output_dim, hidden), jnp.float32, -bound, bound)
    b_out = jax.random.uniform(ks[6], (output_dim,), jnp.float32, -bound, bound)

    y = lstm_regression_forward(x, w_ih, w_hh, b_ih, b_hh, w_out, b_out)
    y = jax.block_until_ready(y)

    y_ref = lstm_regression_reference(x, w_ih, w_hh, b_ih, b_hh, w_out, b_out)
    assert y.shape == (S, B, output_dim), y.shape
    # Kernel uses bf16 MXU operands (f32 accumulation) vs. the full-f32
    # reference, so allow a bf16-level tolerance.
    assert jnp.allclose(y, y_ref, rtol=2e-2, atol=2e-2), (
        float(jnp.max(jnp.abs(y - y_ref))))

    print("KERNEL_OK")
</pallas_src>

<mosaic_0001>
module attributes {stable_mosaic.version = 11 : i64} {
  func.func @_lstm_regression_kernel(%arg0: memref<32x16xbf16, #tpu.memory_space<vmem>>, %arg1: memref<16x128xbf16, #tpu.memory_space<vmem>>, %arg2: memref<32x128xbf16, #tpu.memory_space<vmem>>, %arg3: memref<1x128xf32, #tpu.memory_space<vmem>>, %arg4: memref<32x128xbf16, #tpu.memory_space<vmem>>, %arg5: memref<1x128xf32, #tpu.memory_space<vmem>>, %arg6: memref<32x128xf32, #tpu.memory_space<vmem>>) attributes {dimension_semantics = [], scalar_prefetch = 0 : i64, scratch_operands = 0 : i64, tpu.core_type = #tpu.core_type<tc>} {
    %c0 = arith.constant 0 : index
    %c0_0 = arith.constant 0 : index
    %0 = vector.load %arg0[%c0, %c0_0] : memref<32x16xbf16, #tpu.memory_space<vmem>>, vector<32x16xbf16>
    %c0_1 = arith.constant 0 : index
    %c0_2 = arith.constant 0 : index
    %1 = vector.load %arg1[%c0_1, %c0_2] : memref<16x128xbf16, #tpu.memory_space<vmem>>, vector<16x128xbf16>
    %cst = arith.constant dense<0.000000e+00> : vector<32x128xf32>
    %2 = tpu.matmul %0, %1, %cst {dimension_numbers = #tpu.dot_dimension_numbers<[1], [0], [0], [1], [0, 0, 1, 1], [], []>} : vector<32x16xbf16>, vector<16x128xbf16>, vector<32x128xf32> -> vector<32x128xf32>
    %c0_3 = arith.constant 0 : index
    %c0_4 = arith.constant 0 : index
    %3 = vector.load %arg3[%c0_3, %c0_4] : memref<1x128xf32, #tpu.memory_space<vmem>>, vector<1x128xf32>
    %4 = vector.broadcast %3 : vector<1x128xf32> to vector<32x128xf32>
    %5 = arith.addf %2, %4 : vector<32x128xf32>
    %c0_5 = arith.constant 0 : index
    %c0_6 = arith.constant 0 : index
    %6 = vector.load %arg2[%c0_5, %c0_6] : memref<32x128xbf16, #tpu.memory_space<vmem>>, vector<32x128xbf16>
    %cst_7 = arith.constant 0.000000e+00 : f32
    %7 = vector.broadcast %cst_7 : f32 to vector<4x32xf32>
    %cst_8 = arith.constant 0.000000e+00 : f32
    %8 = vector.broadcast %cst_8 : f32 to vector<4x32xf32>
    %9 = vector.extract_strided_slice %5 {offsets = [0, 0], sizes = [4, 128], strides = [1, 1]} : vector<32x128xf32> to vector<4x128xf32>
    %10 = arith.truncf %7 : vector<4x32xf32> to vector<4x32xbf16>
    %cst_9 = arith.constant dense<0.000000e+00> : vector<4x128xf32>
    %11 = tpu.matmul %10, %6, %cst_9 {dimension_numbers = #tpu.dot_dimension_numbers<[1], [0], [0], [1], [0, 0, 1, 1], [], []>} : vector<4x32xbf16>, vector<32x128xbf16>, vector<4x128xf32> -> vector<4x128xf32>
    %12 = arith.addf %9, %11 : vector<4x128xf32>
    %13 = vector.extract_strided_slice %12 {offsets = [0, 0], sizes = [4, 96], strides = [1, 1]} : vector<4x128xf32> to vector<4x96xf32>
    %cst_10 = arith.constant 5.000000e-01 : f32
    %14 = vector.broadcast %cst_10 : f32 to vector<4x96xf32>
    %15 = arith.mulf %14, %13 : vector<4x96xf32>
    %16 = math.tanh %15 : vector<4x96xf32>
    %cst_11 = arith.constant 5.000000e-01 : f32
    %17 = vector.broadcast %cst_11 : f32 to vector<4x96xf32>
    %18 = arith.mulf %17, %16 : vector<4x96xf32>
    %cst_12 = arith.constant 5.000000e-01 : f32
    %19 = vector.broadcast %cst_12 : f32 to vector<4x96xf32>
    %20 = arith.addf %18, %19 : vector<4x96xf32>
    %21 = vector.extract_strided_slice %12 {offsets = [0, 96], sizes = [4, 32], strides = [1, 1]} : vector<4x128xf32> to vector<4x32xf32>
    %22 = math.tanh %21 : vector<4x32xf32>
    %23 = vector.extract_strided_slice %20 {offsets = [0, 0], sizes = [4, 32], strides = [1, 1]} : vector<4x96xf32> to vector<4x32xf32>
    %24 = vector.extract_strided_slice %20 {offsets = [0, 32], sizes = [4, 32], strides = [1, 1]} : vector<4x96xf32> to vector<4x32xf32>
    %25 = vector.extract_strided_slice %20 {offsets = [0, 64], sizes = [4, 32], strides = [1, 1]} : vector<4x96xf32> to vector<4x32xf32>
    %26 = arith.mulf %24, %8 : vector<4x32xf32>
    %27 = arith.mulf %23, %22 : vector<4x32xf32>
    %28 = arith.addf %26, %27 : vector<4x32xf32>
    %29 = math.tanh %28 : vector<4x32xf32>
    %30 = arith.mulf %25, %29 : vector<4x32xf32>
    %31 = vector.extract_strided_slice %5 {offsets = [4, 0], sizes = [4, 128], strides = [1, 1]} : vector<32x128xf32> to vector<4x128xf32>
    %32 = arith.truncf %30 : vector<4x32xf32> to vector<4x32xbf16>
    %cst_13 = arith.constant dense<0.000000e+00> : vector<4x128xf32>
    %33 = tpu.matmul %32, %6, %cst_13 {dimension_numbers = #tpu.dot_dimension_numbers<[1], [0], [0], [1], [0, 0, 1, 1], [], []>} : vector<4x32xbf16>, vector<32x128xbf16>, vector<4x128xf32> -> vector<4x128xf32>
    %34 = arith.addf %31, %33 : vector<4x128xf32>
    %35 = vector.extract_strided_slice %34 {offsets = [0, 0], sizes = [4, 96], strides = [1, 1]} : vector<4x128xf32> to vector<4x96xf32>
    %cst_14 = arith.constant 5.000000e-01 : f32
    %36 = vector.broadcast %cst_14 : f32 to vector<4x96xf32>
    %37 = arith.mulf %36, %35 : vector<4x96xf32>
    %38 = math.tanh %37 : vector<4x96xf32>
    %cst_15 = arith.constant 5.000000e-01 : f32
    %39 = vector.broadcast %cst_15 : f32 to vector<4x96xf32>
    %40 = arith.mulf %39, %38 : vector<4x96xf32>
    %cst_16 = arith.constant 5.000000e-01 : f32
    %41 = vector.broadcast %cst_16 : f32 to vector<4x96xf32>
    %42 = arith.addf %40, %41 : vector<4x96xf32>
    %43 = vector.extract_strided_slice %34 {offsets = [0, 96], sizes = [4, 32], strides = [1, 1]} : vector<4x128xf32> to vector<4x32xf32>
    %44 = math.tanh %43 : vector<4x32xf32>
    %45 = vector.extract_strided_slice %42 {offsets = [0, 0], sizes = [4, 32], strides = [1, 1]} : vector<4x96xf32> to vector<4x32xf32>
    %46 = vector.extract_strided_slice %42 {offsets = [0, 32], sizes = [4, 32], strides = [1, 1]} : vector<4x96xf32> to vector<4x32xf32>
    %47 = vector.extract_strided_slice %42 {offsets = [0, 64], sizes = [4, 32], strides = [1, 1]} : vector<4x96xf32> to vector<4x32xf32>
    %48 = arith.mulf %46, %28 : vector<4x32xf32>
    %49 = arith.mulf %45, %44 : vector<4x32xf32>
    %50 = arith.addf %48, %49 : vector<4x32xf32>
    %51 = math.tanh %50 : vector<4x32xf32>
    %52 = arith.mulf %47, %51 : vector<4x32xf32>
    %53 = vector.extract_strided_slice %5 {offsets = [8, 0], sizes = [4, 128], strides = [1, 1]} : vector<32x128xf32> to vector<4x128xf32>
    %54 = arith.truncf %52 : vector<4x32xf32> to vector<4x32xbf16>
    %cst_17 = arith.constant dense<0.000000e+00> : vector<4x128xf32>
    %55 = tpu.matmul %54, %6, %cst_17 {dimension_numbers = #tpu.dot_dimension_numbers<[1], [0], [0], [1], [0, 0, 1, 1], [], []>} : vector<4x32xbf16>, vector<32x128xbf16>, vector<4x128xf32> -> vector<4x128xf32>
    %56 = arith.addf %53, %55 : vector<4x128xf32>
    %57 = vector.extract_strided_slice %56 {offsets = [0, 0], sizes = [4, 96], strides = [1, 1]} : vector<4x128xf32> to vector<4x96xf32>
    %cst_18 = arith.constant 5.000000e-01 : f32
    %58 = vector.broadcast %cst_18 : f32 to vector<4x96xf32>
    %59 = arith.mulf %58, %57 : vector<4x96xf32>
    %60 = math.tanh %59 : vector<4x96xf32>
    %cst_19 = arith.constant 5.000000e-01 : f32
    %61 = vector.broadcast %cst_19 : f32 to vector<4x96xf32>
    %62 = arith.mulf %61, %60 : vector<4x96xf32>
    %cst_20 = arith.constant 5.000000e-01 : f32
    %63 = vector.broadcast %cst_20 : f32 to vector<4x96xf32>
    %64 = arith.addf %62, %63 : vector<4x96xf32>
    %65 = vector.extract_strided_slice %56 {offsets = [0, 96], sizes = [4, 32], strides = [1, 1]} : vector<4x128xf32> to vector<4x32xf32>
    %66 = math.tanh %65 : vector<4x32xf32>
    %67 = vector.extract_strided_slice %64 {offsets = [0, 0], sizes = [4, 32], strides = [1, 1]} : vector<4x96xf32> to vector<4x32xf32>
    %68 = vector.extract_strided_slice %64 {offsets = [0, 32], sizes = [4, 32], strides = [1, 1]} : vector<4x96xf32> to vector<4x32xf32>
    %69 = vector.extract_strided_slice %64 {offsets = [0, 64], sizes = [4, 32], strides = [1, 1]} : vector<4x96xf32> to vector<4x32xf32>
    %70 = arith.mulf %68, %50 : vector<4x32xf32>
    %71 = arith.mulf %67, %66 : vector<4x32xf32>
    %72 = arith.addf %70, %71 : vector<4x32xf32>
    %73 = math.tanh %72 : vector<4x32xf32>
    %74 = arith.mulf %69, %73 : vector<4x32xf32>
    %75 = vector.extract_strided_slice %5 {offsets = [12, 0], sizes = [4, 128], strides = [1, 1]} : vector<32x128xf32> to vector<4x128xf32>
    %76 = arith.truncf %74 : vector<4x32xf32> to vector<4x32xbf16>
    %cst_21 = arith.constant dense<0.000000e+00> : vector<4x128xf32>
    %77 = tpu.matmul %76, %6, %cst_21 {dimension_numbers = #tpu.dot_dimension_numbers<[1], [0], [0], [1], [0, 0, 1, 1], [], []>} : vector<4x32xbf16>, vector<32x128xbf16>, vector<4x128xf32> -> vector<4x128xf32>
    %78 = arith.addf %75, %77 : vector<4x128xf32>
    %79 = vector.extract_strided_slice %78 {offsets = [0, 0], sizes = [4, 96], strides = [1, 1]} : vector<4x128xf32> to vector<4x96xf32>
    %cst_22 = arith.constant 5.000000e-01 : f32
    %80 = vector.broadcast %cst_22 : f32 to vector<4x96xf32>
    %81 = arith.mulf %80, %79 : vector<4x96xf32>
    %82 = math.tanh %81 : vector<4x96xf32>
    %cst_23 = arith.constant 5.000000e-01 : f32
    %83 = vector.broadcast %cst_23 : f32 to vector<4x96xf32>
    %84 = arith.mulf %83, %82 : vector<4x96xf32>
    %cst_24 = arith.constant 5.000000e-01 : f32
    %85 = vector.broadcast %cst_24 : f32 to vector<4x96xf32>
    %86 = arith.addf %84, %85 : vector<4x96xf32>
    %87 = vector.extract_strided_slice %78 {offsets = [0, 96], sizes = [4, 32], strides = [1, 1]} : vector<4x128xf32> to vector<4x32xf32>
    %88 = math.tanh %87 : vector<4x32xf32>
    %89 = vector.extract_strided_slice %86 {offsets = [0, 0], sizes = [4, 32], strides = [1, 1]} : vector<4x96xf32> to vector<4x32xf32>
    %90 = vector.extract_strided_slice %86 {offsets = [0, 32], sizes = [4, 32], strides = [1, 1]} : vector<4x96xf32> to vector<4x32xf32>
    %91 = vector.extract_strided_slice %86 {offsets = [0, 64], sizes = [4, 32], strides = [1, 1]} : vector<4x96xf32> to vector<4x32xf32>
    %92 = arith.mulf %90, %72 : vector<4x32xf32>
    %93 = arith.mulf %89, %88 : vector<4x32xf32>
    %94 = arith.addf %92, %93 : vector<4x32xf32>
    %95 = math.tanh %94 : vector<4x32xf32>
    %96 = arith.mulf %91, %95 : vector<4x32xf32>
    %97 = vector.extract_strided_slice %5 {offsets = [16, 0], sizes = [4, 128], strides = [1, 1]} : vector<32x128xf32> to vector<4x128xf32>
    %98 = arith.truncf %96 : vector<4x32xf32> to vector<4x32xbf16>
    %cst_25 = arith.constant dense<0.000000e+00> : vector<4x128xf32>
    %99 = tpu.matmul %98, %6, %cst_25 {dimension_numbers = #tpu.dot_dimension_numbers<[1], [0], [0], [1], [0, 0, 1, 1], [], []>} : vector<4x32xbf16>, vector<32x128xbf16>, vector<4x128xf32> -> vector<4x128xf32>
    %100 = arith.addf %97, %99 : vector<4x128xf32>
    %101 = vector.extract_strided_slice %100 {offsets = [0, 0], sizes = [4, 96], strides = [1, 1]} : vector<4x128xf32> to vector<4x96xf32>
    %cst_26 = arith.constant 5.000000e-01 : f32
    %102 = vector.broadcast %cst_26 : f32 to vector<4x96xf32>
    %103 = arith.mulf %102, %101 : vector<4x96xf32>
    %104 = math.tanh %103 : vector<4x96xf32>
    %cst_27 = arith.constant 5.000000e-01 : f32
    %105 = vector.broadcast %cst_27 : f32 to vector<4x96xf32>
    %106 = arith.mulf %105, %104 : vector<4x96xf32>
    %cst_28 = arith.constant 5.000000e-01 : f32
    %107 = vector.broadcast %cst_28 : f32 to vector<4x96xf32>
    %108 = arith.addf %106, %107 : vector<4x96xf32>
    %109 = vector.extract_strided_slice %100 {offsets = [0, 96], sizes = [4, 32], strides = [1, 1]} : vector<4x128xf32> to vector<4x32xf32>
    %110 = math.tanh %109 : vector<4x32xf32>
    %111 = vector.extract_strided_slice %108 {offsets = [0, 0], sizes = [4, 32], strides = [1, 1]} : vector<4x96xf32> to vector<4x32xf32>
    %112 = vector.extract_strided_slice %108 {offsets = [0, 32], sizes = [4, 32], strides = [1, 1]} : vector<4x96xf32> to vector<4x32xf32>
    %113 = vector.extract_strided_slice %108 {offsets = [0, 64], sizes = [4, 32], strides = [1, 1]} : vector<4x96xf32> to vector<4x32xf32>
    %114 = arith.mulf %112, %94 : vector<4x32xf32>
    %115 = arith.mulf %111, %110 : vector<4x32xf32>
    %116 = arith.addf %114, %115 : vector<4x32xf32>
    %117 = math.tanh %116 : vector<4x32xf32>
    %118 = arith.mulf %113, %117 : vector<4x32xf32>
    %119 = vector.extract_strided_slice %5 {offsets = [20, 0], sizes = [4, 128], strides = [1, 1]} : vector<32x128xf32> to vector<4x128xf32>
    %120 = arith.truncf %118 : vector<4x32xf32> to vector<4x32xbf16>
    %cst_29 = arith.constant dense<0.000000e+00> : vector<4x128xf32>
    %121 = tpu.matmul %120, %6, %cst_29 {dimension_numbers = #tpu.dot_dimension_numbers<[1], [0], [0], [1], [0, 0, 1, 1], [], []>} : vector<4x32xbf16>, vector<32x128xbf16>, vector<4x128xf32> -> vector<4x128xf32>
    %122 = arith.addf %119, %121 : vector<4x128xf32>
    %123 = vector.extract_strided_slice %122 {offsets = [0, 0], sizes = [4, 96], strides = [1, 1]} : vector<4x128xf32> to vector<4x96xf32>
    %cst_30 = arith.constant 5.000000e-01 : f32
    %124 = vector.broadcast %cst_30 : f32 to vector<4x96xf32>
    %125 = arith.mulf %124, %123 : vector<4x96xf32>
    %126 = math.tanh %125 : vector<4x96xf32>
    %cst_31 = arith.constant 5.000000e-01 : f32
    %127 = vector.broadcast %cst_31 : f32 to vector<4x96xf32>
    %128 = arith.mulf %127, %126 : vector<4x96xf32>
    %cst_32 = arith.constant 5.000000e-01 : f32
    %129 = vector.broadcast %cst_32 : f32 to vector<4x96xf32>
    %130 = arith.addf %128, %129 : vector<4x96xf32>
    %131 = vector.extract_strided_slice %122 {offsets = [0, 96], sizes = [4, 32], strides = [1, 1]} : vector<4x128xf32> to vector<4x32xf32>
    %132 = math.tanh %131 : vector<4x32xf32>
    %133 = vector.extract_strided_slice %130 {offsets = [0, 0], sizes = [4, 32], strides = [1, 1]} : vector<4x96xf32> to vector<4x32xf32>
    %134 = vector.extract_strided_slice %130 {offsets = [0, 32], sizes = [4, 32], strides = [1, 1]} : vector<4x96xf32> to vector<4x32xf32>
    %135 = vector.extract_strided_slice %130 {offsets = [0, 64], sizes = [4, 32], strides = [1, 1]} : vector<4x96xf32> to vector<4x32xf32>
    %136 = arith.mulf %134, %116 : vector<4x32xf32>
    %137 = arith.mulf %133, %132 : vector<4x32xf32>
    %138 = arith.addf %136, %137 : vector<4x32xf32>
    %139 = math.tanh %138 : vector<4x32xf32>
    %140 = arith.mulf %135, %139 : vector<4x32xf32>
    %141 = vector.extract_strided_slice %5 {offsets = [24, 0], sizes = [4, 128], strides = [1, 1]} : vector<32x128xf32> to vector<4x128xf32>
    %142 = arith.truncf %140 : vector<4x32xf32> to vector<4x32xbf16>
    %cst_33 = arith.constant dense<0.000000e+00> : vector<4x128xf32>
    %143 = tpu.matmul %142, %6, %cst_33 {dimension_numbers = #tpu.dot_dimension_numbers<[1], [0], [0], [1], [0, 0, 1, 1], [], []>} : vector<4x32xbf16>, vector<32x128xbf16>, vector<4x128xf32> -> vector<4x128xf32>
    %144 = arith.addf %141, %143 : vector<4x128xf32>
    %145 = vector.extract_strided_slice %144 {offsets = [0, 0], sizes = [4, 96], strides = [1, 1]} : vector<4x128xf32> to vector<4x96xf32>
    %cst_34 = arith.constant 5.000000e-01 : f32
    %146 = vector.broadcast %cst_34 : f32 to vector<4x96xf32>
    %147 = arith.mulf %146, %145 : vector<4x96xf32>
    %148 = math.tanh %147 : vector<4x96xf32>
    %cst_35 = arith.constant 5.000000e-01 : f32
    %149 = vector.broadcast %cst_35 : f32 to vector<4x96xf32>
    %150 = arith.mulf %149, %148 : vector<4x96xf32>
    %cst_36 = arith.constant 5.000000e-01 : f32
    %151 = vector.broadcast %cst_36 : f32 to vector<4x96xf32>
    %152 = arith.addf %150, %151 : vector<4x96xf32>
    %153 = vector.extract_strided_slice %144 {offsets = [0, 96], sizes = [4, 32], strides = [1, 1]} : vector<4x128xf32> to vector<4x32xf32>
    %154 = math.tanh %153 : vector<4x32xf32>
    %155 = vector.extract_strided_slice %152 {offsets = [0, 0], sizes = [4, 32], strides = [1, 1]} : vector<4x96xf32> to vector<4x32xf32>
    %156 = vector.extract_strided_slice %152 {offsets = [0, 32], sizes = [4, 32], strides = [1, 1]} : vector<4x96xf32> to vector<4x32xf32>
    %157 = vector.extract_strided_slice %152 {offsets = [0, 64], sizes = [4, 32], strides = [1, 1]} : vector<4x96xf32> to vector<4x32xf32>
    %158 = arith.mulf %156, %138 : vector<4x32xf32>
    %159 = arith.mulf %155, %154 : vector<4x32xf32>
    %160 = arith.addf %158, %159 : vector<4x32xf32>
    %161 = math.tanh %160 : vector<4x32xf32>
    %162 = arith.mulf %157, %161 : vector<4x32xf32>
    %163 = vector.extract_strided_slice %5 {offsets = [28, 0], sizes = [4, 128], strides = [1, 1]} : vector<32x128xf32> to vector<4x128xf32>
    %164 = arith.truncf %162 : vector<4x32xf32> to vector<4x32xbf16>
    %cst_37 = arith.constant dense<0.000000e+00> : vector<4x128xf32>
    %165 = tpu.matmul %164, %6, %cst_37 {dimension_numbers = #tpu.dot_dimension_numbers<[1], [0], [0], [1], [0, 0, 1, 1], [], []>} : vector<4x32xbf16>, vector<32x128xbf16>, vector<4x128xf32> -> vector<4x128xf32>
    %166 = arith.addf %163, %165 : vector<4x128xf32>
    %167 = vector.extract_strided_slice %166 {offsets = [0, 0], sizes = [4, 96], strides = [1, 1]} : vector<4x128xf32> to vector<4x96xf32>
    %cst_38 = arith.constant 5.000000e-01 : f32
    %168 = vector.broadcast %cst_38 : f32 to vector<4x96xf32>
    %169 = arith.mulf %168, %167 : vector<4x96xf32>
    %170 = math.tanh %169 : vector<4x96xf32>
    %cst_39 = arith.constant 5.000000e-01 : f32
    %171 = vector.broadcast %cst_39 : f32 to vector<4x96xf32>
    %172 = arith.mulf %171, %170 : vector<4x96xf32>
    %cst_40 = arith.constant 5.000000e-01 : f32
    %173 = vector.broadcast %cst_40 : f32 to vector<4x96xf32>
    %174 = arith.addf %172, %173 : vector<4x96xf32>
    %175 = vector.extract_strided_slice %166 {offsets = [0, 96], sizes = [4, 32], strides = [1, 1]} : vector<4x128xf32> to vector<4x32xf32>
    %176 = math.tanh %175 : vector<4x32xf32>
    %177 = vector.extract_strided_slice %174 {offsets = [0, 0], sizes = [4, 32], strides = [1, 1]} : vector<4x96xf32> to vector<4x32xf32>
    %178 = vector.extract_strided_slice %174 {offsets = [0, 32], sizes = [4, 32], strides = [1, 1]} : vector<4x96xf32> to vector<4x32xf32>
    %179 = vector.extract_strided_slice %174 {offsets = [0, 64], sizes = [4, 32], strides = [1, 1]} : vector<4x96xf32> to vector<4x32xf32>
    %180 = arith.mulf %178, %160 : vector<4x32xf32>
    %181 = arith.mulf %177, %176 : vector<4x32xf32>
    %182 = arith.addf %180, %181 : vector<4x32xf32>
    %183 = math.tanh %182 : vector<4x32xf32>
    %184 = arith.mulf %179, %183 : vector<4x32xf32>
    %185 = tpu.concatenate %30, %52, %74, %96, %118, %140, %162, %184 in 0 : vector<4x32xf32>, vector<4x32xf32>, vector<4x32xf32>, vector<4x32xf32>, vector<4x32xf32>, vector<4x32xf32>, vector<4x32xf32>, vector<4x32xf32> -> vector<32x32xf32>
    %186 = arith.truncf %185 : vector<32x32xf32> to vector<32x32xbf16>
    %c0_41 = arith.constant 0 : index
    %c0_42 = arith.constant 0 : index
    %187 = vector.load %arg4[%c0_41, %c0_42] : memref<32x128xbf16, #tpu.memory_space<vmem>>, vector<32x128xbf16>
    %cst_43 = arith.constant dense<0.000000e+00> : vector<32x128xf32>
    %188 = tpu.matmul %186, %187, %cst_43 {dimension_numbers = #tpu.dot_dimension_numbers<[1], [0], [0], [1], [0, 0, 1, 1], [], []>} : vector<32x32xbf16>, vector<32x128xbf16>, vector<32x128xf32> -> vector<32x128xf32>
    %c0_44 = arith.constant 0 : index
    %c0_45 = arith.constant 0 : index
    %189 = vector.load %arg5[%c0_44, %c0_45] : memref<1x128xf32, #tpu.memory_space<vmem>>, vector<1x128xf32>
    %190 = vector.broadcast %189 : vector<1x128xf32> to vector<32x128xf32>
    %191 = arith.addf %188, %190 : vector<32x128xf32>
    %c0_46 = arith.constant 0 : index
    %c0_47 = arith.constant 0 : index
    %192 = vector.load %arg6[%c0_46, %c0_47] : memref<32x128xf32, #tpu.memory_space<vmem>>, vector<32x128xf32>
    tpu.vector_store %arg6[%c0_46, %c0_47], %191 {strides = array<i32>} : memref<32x128xf32, #tpu.memory_space<vmem>>, vector<32x128xf32>,
    return
  }
}

</mosaic_0001>

<bundles_post_ra>
// kernel: tpu_custom_call.1
= control target key start
LH: loop header
LB: loop body
LE: loop exit
PB: predicated region body
PF: predicated region fallthrough
CT: control target
= control target key end

     0   :  { %11 = vsyncpa [#allocation3], 0  ;;  %s1321_s0 = inlined_call_operand.vmem [shape: bf16[32,16], index: 0, kind: input, shape index: {}]   ;;  %s1322_s1 = inlined_call_operand.hbm [shape: bf16[16,128], index: 1, kind: input, shape index: {}]   ;;  %s1323_s2 = inlined_call_operand.vmem [shape: bf16[32,128], index: 2, kind: input, shape index: {}]   ;;  %s1324_s3 = inlined_call_operand.vmem [shape: f32[1,128], index: 3, kind: input, shape index: {}]   ;;  %s1325_s4 = inlined_call_operand.vmem [shape: bf16[32,128], index: 4, kind: input, shape index: {}]   ;;  %s1326_s5 = inlined_call_operand.vmem [shape: f32[1,128], index: 5, kind: input, shape index: {}]   ;;  %s1327_s6 = inlined_call_operand.hbm [shape: f32[32,128], index: 6, kind: output, shape index: {}]  }
   0x1   :  { %12 = vsyncpa [#allocation4], 0  ;;  %s1087_s21 = smov [#allocation2]   ;;  %s1039_s25 = scalar_lea.hbm %s1322_s1, 128 }
   0x2   :  { %s20_s22 = sshll.u32 %s1087_s21, 4  ;;  %p1040_p0 = scmp.ne.s32.totalorder %s1322_s1, %s1039_s25  ;;  %s21_s22 = int_to_ptr.vmem [resolvable:$true] %s20_s22 }
   0x3   :  { %p1043_p1 = scmp.lt.u32.totalorder %s1039_s25, %s1322_s1 }
   0x5   :  { %p1045_p2 = pnand %p1043_p1, %p1040_p0 }
   0x7   :  { %1048 = shalt.err (!%p1045_p2)
}
   0x8   :  { %s1049_s30 = scalar_lea.vmem %s21_s22, 128  ;;  %p1054_p4 = scmp.lt.s32.totalorder %s21_s22, %s21_s22 }
   0x9   :  { %p1050_p3 = scmp.ne.s32.totalorder %s21_s22, %s1049_s30  ;;  %p1055_p5 = scmp.lt.s32.totalorder %s1049_s30, %s1049_s30 }
   0xb   :  { %p1056_p6 = por %p1055_p5, %p1054_p4 }
   0xd   :  { %p1057_p7 = pnand %p1056_p6, %p1050_p3 }
   0xf   :  { %1060 = shalt.err (!%p1057_p7)
}
  0x10   :  { %s1088_s7 = smov 64   ;;  %s1089_s8 = smov 4  }
  0x11   :  { %26 = dma.hbm_to_vmem [thread:$0]  %s1322_s1, 128, %s21_s22, [#allocation3], %s1088_s7, %s1088_s7, %s1089_s8  }
  0x12   :  { %1083 = dma.done.wait [#allocation3], 128  }
  0x13   :  { %1084 = vsyncadd [#allocation3], 4294967168  ;;  %v1090_v0 = vmov 0.0   ;;  %vm1091_vm0 = vmmov 0   ;;  %v984_v1 = vld [vmem:[#allocation2] sm:$0xff]   ;;  %vm68_vm1 = vcmask 130048  }
  0x14   :  { %902 = vmatprep.subr.bf16.mxu1 %v1090_v0  ;;  %906 = vmatprep.mubr.msk.bf16.mxu1 %vm1091_vm0, %v1090_v0  ;;  %v1152_v2 = vld [vmem:[%s1323_s2] sm:$0xff]   ;;  %v987_v4 = vld [vmem:[%s1321_s0 + $0x8] sm:$0xff]   ;;  %v1092_v6 = vmov 0   ;;  %s1093_s18 = smov 32   ;;  %vm140_vm2 = vcmask 261120   ;;  %vm733_vm3 = vcmask 1043456  }
  0x15   :  { %896 = vmatprep.subr.bf16.mxu0 %v984_v1  ;;  %v986_v3 = vld [vmem:[%s1321_s0] sm:$0xff]   ;;  %903 = vmatpush3.bf16.msra.mxu1 %v1152_v2  ;;  %v1165_v5 = vld [vmem:[%s1323_s2 + $0x8] sm:$0xff]   ;;  %s1094_s23 = smov [#allocation5]  }
  0x16   :  { %897 = vmatpush3.bf16.msra.mxu0 %v984_v1  ;;  %898 = vmatprep.mubr.msk.bf16.mxu0 %vm68_vm1, %v986_v3  ;;  %v845_v7 = vld [vmem:[%s1324_s3] ss:$0 sm:$0xff]  ;;  %s833_s24 = sshll.u32 %s1094_s23, 4  ;;  %s834_s24 = int_to_ptr.vmem [resolvable:$true] %s833_s24 }
  0x17   :  { %904 = vmatprep.subr.bf16.mxu1 %v1090_v0  ;;  %910 = vmatprep.subr.bf16.mxu0 %v1090_v0  ;;  %s1061_s25 = scalar_lea.vmem %s834_s24, 512  ;;  %p1066_p9 = scmp.lt.s32.totalorder %s834_s24, %s834_s24 }
  0x18   :  { %p1062_p8 = scmp.ne.s32.totalorder %s834_s24, %s1061_s25  ;;  %p1067_p10 = scmp.lt.s32.totalorder %s1061_s25, %s1061_s25 }
  0x19   :  { %899 = vmatmul.mubr.msk.bf16.vlgmr.msra.gmra.mrb[0].mxu0 %vm68_vm1, %v987_v4  ;;  %905 = vmatpush3.bf16.msra.mxu1 %v1165_v5 }
  0x1a   :  { %911 = vmatpush3.bf16.msra.mxu0 %v1152_v2  ;;  %914 = vmatprep.mubr.msk.bf16.mxu0 %vm1091_vm0, %v1090_v0  ;;  %p1068_p11 = por %p1067_p10, %p1066_p9 }
  0x1b   :  { %912 = vmatprep.subr.bf16.mxu0 %v1090_v0  ;;  %918 = vmatprep.subr.bf16.mxu1 %v1090_v0 }
  0x1c   :  { %907 = vmatmul.mubr.bf16.vlgmr.msra.gmra.mrb[0].mxu1 %v1092_v6  ;;  %p1069_p12 = pnand %p1068_p11, %p1062_p8 }
  0x1d   :  { %919 = vmatpush3.bf16.msra.mxu1 %v1152_v2  ;;  %922 = vmatprep.mubr.msk.bf16.mxu1 %vm1091_vm0, %v1090_v0 }
  0x1e   :  { %913 = vmatpush3.bf16.msra.mxu0 %v1165_v5  ;;  %920 = vmatprep.subr.bf16.mxu1 %v1090_v0 }
  0x1f   :  { %926 = vmatprep.subr.bf16.mxu0 %v1090_v0 }
  0x21   :  { %921 = vmatpush3.bf16.msra.mxu1 %v1165_v5 }
  0x22   :  { %934 = vmatprep.subr.bf16.mxu1 %v1090_v0 }
  0xec   :  { %v900_v8 = vpop.f32.mrb[0].mxu0 }
  0xed   :  { %v1185_v9 = vadd.f32 %v900_v8, %v845_v7  ;;  %v109_v10 = vpop.f32.mrb[1].mxu0 }
  0xee   :  { %v110_v11 = vadd.f32 %v845_v7, %v109_v10  ;;  %v901_v12 = vpop.f32.mrb[2].mxu0 }
  0xef   :  { %v1187_v13 = vadd.f32 %v901_v12, %v845_v7  ;;  %v112_v14 = vpop.f32.mrb[3].mxu0  ;;  %v178_v16 = vpop.f32.mrb[0].mxu1 }
  0xf0   :  { %v1189_v15 = vadd.f32 %v845_v7, %v112_v14  ;;  %v184_v17 = vadd.f32 %v178_v16, %v110_v11  ;;  %v908_v18 = vpop.f32.mrb[1].mxu1 }
  0xf1   :  { %v181_v19 = vpop.f32.mrb[2].mxu1 }
  0xf2   :  { %991 = vtanh.f32 %v184_v17  ;;  %v909_v20 = vpop.f32.mrb[3].mxu1  ;;  %v185_v22 = vmul.f32 0.5, %v184_v17 }
  0xf4   :  { %993 = vtanh.f32 %v185_v22 }
  0xfc   :  { %v992_v21 = vpop.eup %991 }
  0xfd   :  { %192 = vrot.lane.b32.xlu0 %v992_v21, %s1093_s18 }
  0xfe   :  { %v994_v23 = vpop.eup %993 }
  0xff   :  { %v187_v24 = vmul.f32 0.5, %v994_v23 }
 0x101   :  { %v188_v25 = vadd.f32 0.5, %v187_v24 }
 0x103   :  { %v190_v28 = vmul.f32 0.0, %v188_v25 }
 0x16f   :  { %v193_v26 = vpop.permute.xlu0 %192 }
 0x170   :  { %v195_v27 = vmul.f32 %v193_v26, %v188_v25 }
 0x172   :  { %197 = vrot.lane.b32.xlu0 %v195_v27, %s1093_s18 }
 0x1e4   :  { %v198_v29 = vpop.permute.xlu0 %197 }
 0x1e5   :  { %v200_v30 = vadd.f32 %v198_v29, %v190_v28 }
 0x1e7   :  { %995 = vtanh.f32 %v200_v30  ;;  %v264_v49 = vrot.slane %v200_v30, 4 }
 0x1f1   :  { %v996_v31 = vpop.eup %995 }
 0x1f2   :  { %203 = vrot.lane.b32.xlu1 %v996_v31, %s1093_s18 }
 0x264   :  { %v204_v32 = vpop.permute.xlu1 %203 }
 0x265   :  { %v1194_v33 = vmul.f32 %v204_v32, %v188_v25 }
 0x267   :  { %v207_v34 = vpack.c.bf16 %v1194_v33, %v1194_v33 }
 0x269   :  { %209 = vrot.lane.b32.xlu1 %v207_v34, %s1088_s7 }
 0x2db   :  { %v210_v35 = vpop.permute.xlu1 %209 }
 0x2dc   :  { %915 = vmatmul.mubr.msk.bf16.vlgmr.msra.gmra.mrb[4].mxu0 %vm140_vm2, %v210_v35 }
 0x2dd   :  { %927 = vmatpush3.bf16.msra.mxu0 %v1152_v2  ;;  %930 = vmatprep.mubr.msk.bf16.mxu0 %vm1091_vm0, %v1090_v0 }
 0x2de   :  { %928 = vmatprep.subr.bf16.mxu0 %v1090_v0 }
 0x2e1   :  { %929 = vmatpush3.bf16.msra.mxu0 %v1165_v5 }
 0x2e2   :  { %942 = vmatprep.subr.bf16.mxu0 %v1090_v0 }
 0x3af   :  { %v248_v36 = vpop.f32.mrb[4].mxu0 }
 0x3b0   :  { %v255_v37 = vrot.slane %v248_v36, 4  ;;  %v916_v38 = vpop.f32.mrb[5].mxu0 }
 0x3b1   :  { %v251_v39 = vpop.f32.mrb[6].mxu0 }
 0x3b2   :  { %v257_v40 = vadd.f32 %v255_v37, %v110_v11  ;;  %v917_v41 = vpop.f32.mrb[7].mxu0 }
 0x3b4   :  { %997 = vtanh.f32 %v257_v40  ;;  %v258_v43 = vmul.f32 0.5, %v257_v40 }
 0x3b6   :  { %999 = vtanh.f32 %v258_v43 }
 0x3be   :  { %v998_v42 = vpop.eup %997 }
 0x3bf   :  { %268 = vrot.lane.b32.xlu0 %v998_v42, %s1093_s18 }
 0x3c0   :  { %v1000_v44 = vpop.eup %999 }
 0x3c1   :  { %v260_v45 = vmul.f32 0.5, %v1000_v44 }
 0x3c3   :  { %v261_v46 = vadd.f32 0.5, %v260_v45 }
 0x3c5   :  { %v266_v50 = vmul.f32 %v264_v49, %v261_v46 }
 0x431   :  { %v269_v47 = vpop.permute.xlu0 %268 }
 0x432   :  { %v271_v48 = vmul.f32 %v269_v47, %v261_v46 }
 0x434   :  { %273 = vrot.lane.b32.xlu1 %v271_v48, %s1093_s18 }
 0x4a6   :  { %v274_v51 = vpop.permute.xlu1 %273 }
 0x4a7   :  { %v276_v52 = vadd.f32 %v274_v51, %v266_v50 }
 0x4a9   :  { %1001 = vtanh.f32 %v276_v52  ;;  %v338_v11 = vrot.slane %v276_v52, 4 }
 0x4b3   :  { %v1002_v53 = vpop.eup %1001 }
 0x4b4   :  { %279 = vrot.lane.b32.xlu0 %v1002_v53, %s1093_s18 }
 0x526   :  { %v280_v54 = vpop.permute.xlu0 %279 }
 0x527   :  { %v1209_v55 = vmul.f32 %v280_v54, %v261_v46 }
 0x529   :  { %v283_v56 = vpack.c.bf16 %v1209_v55, %v1209_v55  ;;  %v1240_v43 = vsel %vm733_vm3, %v1194_v33, %v1209_v55 }
 0x52b   :  { %v285_v57 = vrot.slane %v283_v56, 2 }
 0x52d   :  { %286 = vrot.lane.b32.xlu1 %v285_v57, %s1088_s7 }
 0x59f   :  { %v287_v58 = vpop.permute.xlu1 %286 }
 0x5a0   :  { %923 = vmatmul.mubr.msk.bf16.vlgmr.msra.gmra.mrb[4].mxu1 %vm140_vm2, %v287_v58 }
 0x5a1   :  { %935 = vmatpush3.bf16.msra.mxu1 %v1152_v2  ;;  %938 = vmatprep.mubr.msk.bf16.mxu1 %vm1091_vm0, %v1090_v0 }
 0x5a2   :  { %936 = vmatprep.subr.bf16.mxu1 %v1090_v0 }
 0x5a5   :  { %937 = vmatpush3.bf16.msra.mxu1 %v1165_v5 }
 0x5a6   :  { %950 = vmatprep.subr.bf16.mxu1 %v1090_v0 }
 0x673   :  { %v325_v59 = vpop.f32.mrb[4].mxu1 }
 0x674   :  { %v331_v60 = vadd.f32 %v325_v59, %v1189_v15  ;;  %v924_v61 = vpop.f32.mrb[5].mxu1 }
 0x675   :  { %v328_v62 = vpop.f32.mrb[6].mxu1 }
 0x676   :  { %1003 = vtanh.f32 %v331_v60  ;;  %v925_v63 = vpop.f32.mrb[7].mxu1  ;;  %v332_v3 = vmul.f32 0.5, %v331_v60 }
 0x678   :  { %1005 = vtanh.f32 %v332_v3 }
 0x680   :  { %v1004_v1 = vpop.eup %1003 }
 0x681   :  { %342 = vrot.lane.b32.xlu0 %v1004_v1, %s1093_s18 }
 0x682   :  { %v1006_v4 = vpop.eup %1005 }
 0x683   :  { %v334_v6 = vmul.f32 0.5, %v1006_v4 }
 0x685   :  { %v335_v7 = vadd.f32 0.5, %v334_v6 }
 0x687   :  { %v340_v12 = vmul.f32 %v338_v11, %v335_v7 }
 0x6f3   :  { %v343_v8 = vpop.permute.xlu0 %342 }
 0x6f4   :  { %v345_v10 = vmul.f32 %v343_v8, %v335_v7 }
 0x6f6   :  { %347 = vrot.lane.b32.xlu1 %v345_v10, %s1093_s18 }
 0x768   :  { %v348_v14 = vpop.permute.xlu1 %347 }
 0x769   :  { %v350_v16 = vadd.f32 %v348_v14, %v340_v12 }
 0x76b   :  { %1007 = vtanh.f32 %v350_v16  ;;  %v414_v36 = vrot.slane %v350_v16, 4 }
 0x775   :  { %v1008_v17 = vpop.eup %1007 }
 0x776   :  { %353 = vrot.lane.b32.xlu0 %v1008_v17, %s1093_s18 }
 0x7e8   :  { %v354_v18 = vpop.permute.xlu0 %353 }
 0x7e9   :  { %v356_v19 = vmul.f32 %v354_v18, %v335_v7 }
 0x7eb   :  { %v357_v20 = vpack.c.bf16 %v356_v19, %v356_v19 }
 0x7ed   :  { %359 = vrot.lane.b32.xlu1 %v357_v20, %s1088_s7 }
 0x85f   :  { %v360_v21 = vpop.permute.xlu1 %359 }
 0x860   :  { %931 = vmatmul.mubr.msk.bf16.vlgmr.msra.gmra.mrb[8].mxu0 %vm140_vm2, %v360_v21 }
 0x861   :  { %943 = vmatpush3.bf16.msra.mxu0 %v1152_v2  ;;  %946 = vmatprep.mubr.msk.bf16.mxu0 %vm1091_vm0, %v1090_v0 }
 0x862   :  { %944 = vmatprep.subr.bf16.mxu0 %v1090_v0 }
 0x865   :  { %945 = vmatpush3.bf16.msra.mxu0 %v1165_v5 }
 0x866   :  { %958 = vmatprep.subr.bf16.mxu0 %v1090_v0 }
 0x933   :  { %v398_v22 = vpop.f32.mrb[8].mxu0 }
 0x934   :  { %v405_v23 = vrot.slane %v398_v22, 4  ;;  %v932_v24 = vpop.f32.mrb[9].mxu0 }
 0x935   :  { %v401_v25 = vpop.f32.mrb[10].mxu0 }
 0x936   :  { %v407_v26 = vadd.f32 %v405_v23, %v1189_v15  ;;  %v933_v27 = vpop.f32.mrb[11].mxu0 }
 0x938   :  { %1009 = vtanh.f32 %v407_v26  ;;  %v408_v29 = vmul.f32 0.5, %v407_v26 }
 0x93a   :  { %1011 = vtanh.f32 %v408_v29 }
 0x942   :  { %v1010_v28 = vpop.eup %1009 }
 0x943   :  { %418 = vrot.lane.b32.xlu0 %v1010_v28, %s1093_s18 }
 0x944   :  { %v1012_v30 = vpop.eup %1011 }
 0x945   :  { %v410_v31 = vmul.f32 0.5, %v1012_v30 }
 0x947   :  { %v411_v32 = vadd.f32 0.5, %v410_v31 }
 0x949   :  { %v416_v37 = vmul.f32 %v414_v36, %v411_v32 }
 0x9b5   :  { %v419_v34 = vpop.permute.xlu0 %418 }
 0x9b6   :  { %v421_v35 = vmul.f32 %v419_v34, %v411_v32 }
 0x9b8   :  { %423 = vrot.lane.b32.xlu1 %v421_v35, %s1093_s18 }
 0xa2a   :  { %v424_v38 = vpop.permute.xlu1 %423 }
 0xa2b   :  { %v426_v39 = vadd.f32 %v424_v38, %v416_v37 }
 0xa2d   :  { %1013 = vtanh.f32 %v426_v39  ;;  %v488_v59 = vrot.slane %v426_v39, 4 }
 0xa37   :  { %v1014_v15 = vpop.eup %1013 }
 0xa38   :  { %429 = vrot.lane.b32.xlu0 %v1014_v15, %s1093_s18 }
 0xaaa   :  { %v430_v40 = vpop.permute.xlu0 %429 }
 0xaab   :  { %v432_v41 = vmul.f32 %v430_v40, %v411_v32 }
 0xaad   :  { %v433_v42 = vpack.c.bf16 %v432_v41, %v432_v41  ;;  %v1243_v44 = vsel %vm733_vm3, %v356_v19, %v432_v41 }
 0xaae   :  { %v738_v45 = vpack.c.bf16 %v1243_v44, %v1240_v43 }
 0xaaf   :  { %v435_v46 = vrot.slane %v433_v42, 2 }
 0xab1   :  { %436 = vrot.lane.b32.xlu1 %v435_v46, %s1088_s7 }
 0xb23   :  { %v437_v47 = vpop.permute.xlu1 %436 }
 0xb24   :  { %939 = vmatmul.mubr.msk.bf16.vlgmr.msra.gmra.mrb[8].mxu1 %vm140_vm2, %v437_v47 }
 0xb25   :  { %951 = vmatpush3.bf16.msra.mxu1 %v1152_v2  ;;  %954 = vmatprep.mubr.msk.bf16.mxu1 %vm1091_vm0, %v1090_v0 }
 0xb26   :  { %952 = vmatprep.subr.bf16.mxu1 %v1090_v0 }
 0xb29   :  { %953 = vmatpush3.bf16.msra.mxu1 %v1165_v5 }
 0xbf7   :  { %v475_v33 = vpop.f32.mrb[8].mxu1 }
 0xbf8   :  { %v481_v48 = vadd.f32 %v475_v33, %v1185_v9  ;;  %v940_v49 = vpop.f32.mrb[9].mxu1 }
 0xbf9   :  { %v478_v50 = vpop.f32.mrb[10].mxu1 }
 0xbfa   :  { %1015 = vtanh.f32 %v481_v48  ;;  %v941_v51 = vpop.f32.mrb[11].mxu1  ;;  %v482_v53 = vmul.f32 0.5, %v481_v48 }
 0xbfc   :  { %1017 = vtanh.f32 %v482_v53 }
 0xc04   :  { %v1016_v52 = vpop.eup %1015 }
 0xc05   :  { %492 = vrot.lane.b32.xlu0 %v1016_v52, %s1093_s18 }
 0xc06   :  { %v1018_v54 = vpop.eup %1017 }
 0xc07   :  { %v484_v55 = vmul.f32 0.5, %v1018_v54 }
 0xc09   :  { %v485_v56 = vadd.f32 0.5, %v484_v55 }
 0xc0b   :  { %v490_v60 = vmul.f32 %v488_v59, %v485_v56 }
 0xc77   :  { %v493_v57 = vpop.permute.xlu0 %492 }
 0xc78   :  { %v495_v58 = vmul.f32 %v493_v57, %v485_v56 }
 0xc7a   :  { %497 = vrot.lane.b32.xlu1 %v495_v58, %s1093_s18 }
 0xcec   :  { %v498_v61 = vpop.permute.xlu1 %497 }
 0xced   :  { %v500_v62 = vadd.f32 %v498_v61, %v490_v60 }
 0xcef   :  { %1019 = vtanh.f32 %v500_v62 }
 0xcf9   :  { %v1020_v63 = vpop.eup %1019 }
 0xcfa   :  { %503 = vrot.lane.b32.xlu0 %v1020_v63, %s1093_s18 }
 0xd6c   :  { %v504_v1 = vpop.permute.xlu0 %503 }
 0xd6d   :  { %v1258_v3 = vmul.f32 %v504_v1, %v485_v56 }
 0xd6f   :  { %v507_v4 = vpack.c.bf16 %v1258_v3, %v1258_v3 }
 0xd71   :  { %509 = vrot.lane.b32.xlu1 %v507_v4, %s1088_s7 }
 0xde3   :  { %v510_v6 = vpop.permute.xlu1 %509 }
 0xde4   :  { %947 = vmatmul.mubr.msk.bf16.vlgmr.msra.gmra.mrb[12].mxu0 %vm140_vm2, %v510_v6 }
 0xde5   :  { %959 = vmatpush3.bf16.msra.mxu0 %v1152_v2  ;;  %962 = vmatprep.mubr.msk.bf16.mxu0 %vm1091_vm0, %v1090_v0 }
 0xde6   :  { %960 = vmatprep.subr.bf16.mxu0 %v1090_v0 }
 0xde9   :  { %961 = vmatpush3.bf16.msra.mxu0 %v1165_v5  ;;  %v564_v5 = vrot.slane %v500_v62, 4 }
 0xeb7   :  { %v548_v7 = vpop.f32.mrb[12].mxu0 }
 0xeb8   :  { %v555_v8 = vrot.slane %v548_v7, 4  ;;  %v948_v10 = vpop.f32.mrb[13].mxu0 }
 0xeb9   :  { %v551_v11 = vpop.f32.mrb[14].mxu0  ;;  %v989_v10 = vld [vmem:[%s1325_s4] sm:$0xff]  }
 0xeba   :  { %v557_v12 = vadd.f32 %v555_v8, %v1185_v9  ;;  %v949_v14 = vpop.f32.mrb[15].mxu0  ;;  %v990_v11 = vld [vmem:[%s1325_s4 + $0x8] sm:$0xff]   ;;  %966 = vmatprep.subr.bf16.mxu1 %v989_v10 }
 0xebc   :  { %1021 = vtanh.f32 %v557_v12  ;;  %v558_v17 = vmul.f32 0.5, %v557_v12 }
 0xebe   :  { %1023 = vtanh.f32 %v558_v17 }
 0xec6   :  { %v1022_v16 = vpop.eup %1021 }
 0xec7   :  { %568 = vrot.lane.b32.xlu0 %v1022_v16, %s1093_s18 }
 0xec8   :  { %v1024_v2 = vpop.eup %1023 }
 0xec9   :  { %v560_v18 = vmul.f32 0.5, %v1024_v2  ;;  %v860_v2 = vld [vmem:[%s1326_s5] ss:$0 sm:$0xff] }
 0xecb   :  { %v561_v19 = vadd.f32 0.5, %v560_v18 }
 0xecd   :  { %v566_v21 = vmul.f32 %v564_v5, %v561_v19 }
 0xf39   :  { %v569_v20 = vpop.permute.xlu0 %568 }
 0xf3a   :  { %v571_v0 = vmul.f32 %v569_v20, %v561_v19 }
 0xf3c   :  { %573 = vrot.lane.b32.xlu1 %v571_v0, %s1093_s18 }
 0xfae   :  { %v574_v22 = vpop.permute.xlu1 %573 }
 0xfaf   :  { %v576_v23 = vadd.f32 %v574_v22, %v566_v21 }
 0xfb1   :  { %1025 = vtanh.f32 %v576_v23  ;;  %v638_v41 = vrot.slane %v576_v23, 4 }
 0xfbb   :  { %v1026_v9 = vpop.eup %1025 }
 0xfbc   :  { %579 = vrot.lane.b32.xlu0 %v1026_v9, %s1093_s18 }
0x102e   :  { %v580_v24 = vpop.permute.xlu0 %579 }
0x102f   :  { %v1273_v25 = vmul.f32 %v580_v24, %v561_v19 }
0x1031   :  { %v583_v26 = vpack.c.bf16 %v1273_v25, %v1273_v25  ;;  %v736_v12 = vsel %vm733_vm3, %v1258_v3, %v1273_v25 }
0x1033   :  { %v585_v27 = vrot.slane %v583_v26, 2 }
0x1035   :  { %586 = vrot.lane.b32.xlu1 %v585_v27, %s1088_s7 }
0x10a7   :  { %v587_v28 = vpop.permute.xlu1 %586 }
0x10a8   :  { %955 = vmatmul.mubr.msk.bf16.vlgmr.msra.gmra.mrb[12].mxu1 %vm140_vm2, %v587_v28 }
0x10a9   :  { %967 = vmatpush3.bf16.msra.mxu1 %v989_v10 }
0x10aa   :  { %968 = vmatprep.subr.bf16.mxu1 %v990_v11 }
0x10ad   :  { %969 = vmatpush3.bf16.msra.mxu1 %v990_v11 }
0x117b   :  { %v625_v29 = vpop.f32.mrb[12].mxu1 }
0x117c   :  { %v631_v30 = vadd.f32 %v625_v29, %v1187_v13  ;;  %v956_v31 = vpop.f32.mrb[13].mxu1 }
0x117d   :  { %v628_v32 = vpop.f32.mrb[14].mxu1 }
0x117e   :  { %1027 = vtanh.f32 %v631_v30  ;;  %v957_v34 = vpop.f32.mrb[15].mxu1  ;;  %v632_v36 = vmul.f32 0.5, %v631_v30 }
0x1180   :  { %1029 = vtanh.f32 %v632_v36 }
0x1188   :  { %v1028_v35 = vpop.eup %1027 }
0x1189   :  { %642 = vrot.lane.b32.xlu0 %v1028_v35, %s1093_s18 }
0x118a   :  { %v1030_v37 = vpop.eup %1029 }
0x118b   :  { %v634_v38 = vmul.f32 0.5, %v1030_v37 }
0x118d   :  { %v635_v39 = vadd.f32 0.5, %v634_v38 }
0x118f   :  { %v640_v42 = vmul.f32 %v638_v41, %v635_v39 }
0x11fb   :  { %v643_v15 = vpop.permute.xlu0 %642 }
0x11fc   :  { %v645_v40 = vmul.f32 %v643_v15, %v635_v39 }
0x11fe   :  { %647 = vrot.lane.b32.xlu1 %v645_v40, %s1093_s18 }
0x1270   :  { %v648_v46 = vpop.permute.xlu1 %647 }
0x1271   :  { %v650_v47 = vadd.f32 %v648_v46, %v640_v42 }
0x1273   :  { %1031 = vtanh.f32 %v650_v47 }
0x127d   :  { %v1032_v33 = vpop.eup %1031 }
0x127e   :  { %653 = vrot.lane.b32.xlu0 %v1032_v33, %s1093_s18 }
0x12f0   :  { %v654_v48 = vpop.permute.xlu0 %653 }
0x12f1   :  { %v656_v49 = vmul.f32 %v654_v48, %v635_v39 }
0x12f3   :  { %v657_v50 = vpack.c.bf16 %v656_v49, %v656_v49 }
0x12f5   :  { %659 = vrot.lane.b32.xlu1 %v657_v50, %s1088_s7 }
0x1367   :  { %v660_v51 = vpop.permute.xlu1 %659 }
0x1368   :  { %963 = vmatmul.mubr.msk.bf16.vlgmr.msra.gmra.mrb[16].mxu0 %vm140_vm2, %v660_v51 }
0x143b   :  { %v698_v52 = vpop.f32.mrb[16].mxu0 }
0x143c   :  { %v705_v53 = vrot.slane %v698_v52, 4  ;;  %v964_v54 = vpop.f32.mrb[17].mxu0 }
0x143d   :  { %v701_v55 = vpop.f32.mrb[18].mxu0 }
0x143e   :  { %v707_v56 = vadd.f32 %v705_v53, %v1187_v13  ;;  %v965_v57 = vpop.f32.mrb[19].mxu0  ;;  %v714_v13 = vrot.slane %v650_v47, 4 }
0x1440   :  { %1033 = vtanh.f32 %v707_v56  ;;  %v708_v59 = vmul.f32 0.5, %v707_v56 }
0x1442   :  { %1035 = vtanh.f32 %v708_v59 }
0x144a   :  { %v1034_v58 = vpop.eup %1033 }
0x144b   :  { %718 = vrot.lane.b32.xlu0 %v1034_v58, %s1093_s18 }
0x144c   :  { %v1036_v60 = vpop.eup %1035 }
0x144d   :  { %v710_v61 = vmul.f32 0.5, %v1036_v60 }
0x144f   :  { %v711_v62 = vadd.f32 0.5, %v710_v61 }
0x1451   :  { %v716_v4 = vmul.f32 %v714_v13, %v711_v62 }
0x14bd   :  { %v719_v63 = vpop.permute.xlu0 %718 }
0x14be   :  { %v721_v1 = vmul.f32 %v719_v63, %v711_v62 }
0x14c0   :  { %723 = vrot.lane.b32.xlu1 %v721_v1, %s1093_s18 }
0x14c4   :  { %753 = vrot.lane.b32.xlu1 %v738_v45, %s1088_s7 }
0x1532   :  { %v724_v6 = vpop.permute.xlu1 %723 }
0x1533   :  { %v726_v7 = vadd.f32 %v724_v6, %v716_v4 }
0x1535   :  { %1037 = vtanh.f32 %v726_v7 }
0x1536   :  { %v754_v8 = vpop.permute.xlu1 %753 }
0x1537   :  { %970 = vmatprep.mubr.msk.bf16.mxu1 %vm140_vm2, %v754_v8 }
0x153f   :  { %v1038_v43 = vpop.eup %1037 }
0x1540   :  { %729 = vrot.lane.b32.xlu0 %v1038_v43, %s1093_s18 }
0x15b2   :  { %v730_v44 = vpop.permute.xlu0 %729 }
0x15b3   :  { %v732_v45 = vmul.f32 %v730_v44, %v711_v62 }
0x15b5   :  { %v737_v14 = vsel %vm733_vm3, %v656_v49, %v732_v45 }
0x15b6   :  { %v739_v16 = vpack.c.bf16 %v737_v14, %v736_v12 }
0x15b8   :  { %755 = vrot.lane.b32.xlu0 %v739_v16, %s1088_s7 }
0x162a   :  { %v756_v17 = vpop.permute.xlu0 %755 }
0x162b   :  { %971 = vmatmul.mubr.msk.bf16.vlgmr.msra.gmra.mrb[16].mxu1 %vm140_vm2, %v756_v17 }
0x16fe   :  { %v972_v18 = vpop.f32.mrb[16].mxu1 }
0x16ff   :  { %v818_v19 = vadd.f32 %v972_v18, %v860_v2  ;;  %v809_v20 = vpop.f32.mrb[17].mxu1 }
0x1700   :  { %v810_v0 = vadd.f32 %v860_v2, %v809_v20  ;;  %v973_v5 = vpop.f32.mrb[18].mxu1 }
0x1701   :  { %826 = vst [vmem:[#allocation5 + $0x10] sm:$0xff] %v818_v19  ;;  %v821_v3 = vadd.f32 %v973_v5, %v860_v2  ;;  %v812_v21 = vpop.f32.mrb[19].mxu1 }
0x1702   :  { %824 = vst [vmem:[#allocation5] sm:$0xff] %v810_v0  ;;  %v813_v22 = vadd.f32 %v860_v2, %v812_v21 }
0x1703   :  { %827 = vst [vmem:[#allocation5 + $0x18] sm:$0xff] %v821_v3 }
0x1704   :  { %825 = vst [vmem:[#allocation5 + $0x8] sm:$0xff] %v813_v22 }
0x1705   :  { %1072 = shalt.err (!%p1069_p12)
}
0x1706   :  { %s1073_s27 = scalar_lea.hbm %s1327_s6, 512 }
0x1707   :  { %p1074_p13 = scmp.ne.s32.totalorder %s1327_s6, %s1073_s27  ;;  %p1077_p0 = scmp.lt.u32.totalorder %s1073_s27, %s1327_s6 }
0x1709   :  { %p1079_p1 = pnand %p1077_p0, %p1074_p13 }
0x170b   :  { %1082 = shalt.err (!%p1079_p1)
}
0x170c   :  { %s1095_s8 = smov 128   ;;  %s1096_s9 = smov 8  }
0x170d   :  { %839 = dma.vmem_to_hbm [thread:$0]  %s834_s24, 512, %s1327_s6, [#allocation4], %s1095_s8, %s1095_s8, %s1096_s9  }
0x170e   :  { %1085 = dma.done.wait [#allocation4], 512  }
0x170f   :  { %1086 = vsyncadd [#allocation4], 4294966784 }
0x1710   :  { %843 = vsyncpa [#allocation3], 1 }
0x1711   :  { %844 = vsyncpa [#allocation4], 1 }

</bundles_post_ra>
